<compile_context>
chip_gen: v7x
topology: tpu7x:2x2x1
jax: 0.10.0
libtpu: 0.0.40
codegen_flags: <defaults>
</compile_context>

<pallas_src>
import functools
import math

import jax
import jax.numpy as jnp
from jax.experimental import pallas as pl
from jax.experimental.pallas import tpu as pltpu


def _round_up(x, m):
    return ((x + m - 1) // m) * m


@functools.lru_cache(maxsize=1)
def _memory_config():
    """Return (target x-block bytes, vmem_limit_bytes) for the local chip."""
    try:
        vmem = int(pltpu.get_tpu_info().vmem_capacity_bytes)
    except Exception:
        # Not on TPU / API mismatch: conservative settings, legal on every chip.
        return 8 << 20, 40 << 20
    if vmem <= (64 << 20):
        # v7x-class: 64 MiB VMEM/TC, ~3.2 TB/s HBM. Big blocks amortize the
        # ~0.35us/step overhead; 2 x 16 MiB double-buffered input + outputs
        # stays well under the 44 MiB scoped limit (< 64 MiB physical).
        return 16 << 20, 44 << 20
    # v5e / v6e: 128 MiB VMEM. 16 MiB blocks amortize per-step overhead on v6e
    # and are harmless on v5e; 80 MiB scoped limit << 128 MiB physical. The
    # explicit limit is also what makes >16 MiB double-buffering legal on v5e.
    return 16 << 20, 80 << 20


def _choose_tile_rows(n_rows, row_bytes, target_bytes):
    """Largest sublane-aligned row tile whose block is ~target_bytes (byte-capped)."""
    t = max(8, target_bytes // max(row_bytes, 1))
    t = 1 << (int(t).bit_length() - 1)            # floor to power of two (>= 8)
    t = min(t, _round_up(max(n_rows, 1), 8))      # never more rows than the input
    t = max(8, t)
    # Megacore (v7x): ensure >= 2 grid steps when there is enough work, so both
    # TensorCores get a share of the stream. No-op on single-TC v5e/v6e.
    if n_rows > 8 and pl.cdiv(n_rows, t) < 2:
        t = max(8, _round_up(pl.cdiv(n_rows, 2), 8))
    return int(t)


# --------------------------------------------------------------------------
# Kernels
# --------------------------------------------------------------------------
def _dotprod_kernel(x_ref, b_ref, o_ref):
    # x_ref: (tile, dim), b_ref: (dim, 1), o_ref: (tile, 1).
    # Row dot-product as an MXU matmul with f32 accumulation: avoids the
    # (tile, dim) f32 elementwise temporary and leaves VALU/XLU slots free.
    o_ref[...] = jnp.dot(
        x_ref[...], b_ref[...], preferred_element_type=jnp.float32
    ).astype(o_ref.dtype)


def _dotprod_packed_kernel(x_ref, w_ref, o_ref):
    # x_ref: (tile, 128) holds 128/dim logical rows per lane-row,
    # w_ref: (128, r) block-diagonal replication of b, o_ref: (tile, r).
    o_ref[...] = jnp.dot(
        x_ref[...], w_ref[...], preferred_element_type=jnp.float32
    ).astype(o_ref.dtype)
    # TODO(synk): for dim<=8 a lane-dense (tile*r/128, 128) output slab would avoid
    # masked vst writeback; skipped here to keep the lowering simple and robust.


# --------------------------------------------------------------------------
# Wrappers
# --------------------------------------------------------------------------
def _dotprod_general(h, b, n, dim, out_dtype):
    x = jnp.reshape(h, (-1, dim))
    bc = jnp.reshape(b, (dim, 1))
    target_bytes, vmem_limit = _memory_config()
    elem = jnp.dtype(x.dtype).itemsize
    tile = _choose_tile_rows(n, dim * elem, target_bytes)
    grid = (pl.cdiv(n, tile),)

    out = pl.pallas_call(
        _dotprod_kernel,
        out_shape=jax.ShapeDtypeStruct((n, 1), out_dtype),
        grid_spec=pltpu.PrefetchScalarGridSpec(
            num_scalar_prefetch=0,
            grid=grid,
            in_specs=[
                pl.BlockSpec((tile, dim), lambda i: (i, 0)),
                pl.BlockSpec((dim, 1), lambda i: (0, 0)),
            ],
            out_specs=pl.BlockSpec((tile, 1), lambda i: (i, 0)),
        ),
        compiler_params=pltpu.CompilerParams(
            dimension_semantics=("parallel",),
            vmem_limit_bytes=vmem_limit,
        ),
    )(x, bc)
    return jnp.reshape(out[:, 0], (-1,))


def _dotprod_packed(h, b, n, dim, r, out_dtype):
    # Pack r = 128 // dim logical rows per 128-lane row (flat reshape; only a
    # ragged N pays a small (< r rows) zero-pad in the wrapper).
    n_rows = _round_up(max(n, 1), r)
    flat = jnp.reshape(h, (-1,))
    if n_rows != n:
        pad = jnp.zeros(((n_rows - n) * dim,), dtype=flat.dtype)
        flat = jnp.concatenate([flat, pad])
    n_packed = n_rows // r
    xp = jnp.reshape(flat, (n_packed, 128))

    # Block-diagonal weight: w[j*dim + d, j] = b[0, d], zeros elsewhere.
    w = (jnp.eye(r, dtype=b.dtype)[:, None, :]
         * jnp.reshape(b, (1, dim, 1))).reshape(128, r)

    target_bytes, vmem_limit = _memory_config()
    elem = jnp.dtype(xp.dtype).itemsize
    tile = _choose_tile_rows(n_packed, 128 * elem, target_bytes)
    grid = (pl.cdiv(n_packed, tile),)

    out = pl.pallas_call(
        _dotprod_packed_kernel,
        out_shape=jax.ShapeDtypeStruct((n_packed, r), out_dtype),
        grid_spec=pltpu.PrefetchScalarGridSpec(
            num_scalar_prefetch=0,
            grid=grid,
            in_specs=[
                pl.BlockSpec((tile, 128), lambda i: (i, 0)),
                pl.BlockSpec((128, r), lambda i: (0, 0)),
            ],
            out_specs=pl.BlockSpec((tile, r), lambda i: (i, 0)),
        ),
        compiler_params=pltpu.CompilerParams(
            dimension_semantics=("parallel",),
            vmem_limit_bytes=vmem_limit,
        ),
    )(xp, w)
    # out[i, j] = dot(row i*r + j, b) -> row-major flatten restores order.
    return jnp.reshape(out, (-1,))[:n]


def dotprod_layer(h, b):
    """Pallas equivalent of DotProdLayer.forward.

    h: any shape whose total size is a multiple of dim.
    b: (1, dim) (or (dim,)) parameter.
    returns: 1-D array of shape (h.size // dim,).
    """
    dim = b.shape[-1]
    out_dtype = jnp.result_type(h.dtype, b.dtype)
    n = h.size // dim
    # Lane-dense packed MXU path for small dim that divides 128 (always taken;
    # ragged N is handled with a tiny zero-row pad inside the wrapper).
    if dim < 128 and 128 % dim == 0 and (128 // dim) > 1:
        return _dotprod_packed(h, b, n, dim, 128 // dim, out_dtype)
    return _dotprod_general(h, b, n, dim, out_dtype)


def init_dotprod_params(key, dim, dtype=jnp.float32):
    """Equivalent of reset_parameters: uniform(-1/sqrt(dim), 1/sqrt(dim))."""
    bound = 1.0 / math.sqrt(dim)
    return jax.random.uniform(key, (1, dim), dtype=dtype, minval=-bound, maxval=bound)


if __name__ == "__main__":
    key = jax.random.PRNGKey(0)
    k_p1, k_x1, k_p2, k_x2, k_x3 = jax.random.split(key, 5)

    # 1) Small dim (dim=32 < 128), N multiple of r: packed lane-dense MXU path.
    dim = 32
    b = init_dotprod_params(k_p1, dim)
    h = jax.random.normal(k_x1, (2, 8, dim), dtype=jnp.float32)   # N = 16
    out = jax.block_until_ready(dotprod_layer(h, b))
    ref = jnp.reshape(jnp.reshape(h, (-1, dim)) @ b.T, (-1,))
    assert out.shape == (16,), out.shape
    assert jnp.allclose(out, ref, atol=1e-5, rtol=1e-5)

    # 2) Small dim, ragged N (N=7, r=4): packed path with < r zero-row pad.
    h3 = jax.random.normal(k_x3, (1, 7, dim), dtype=jnp.float32)  # N = 7
    out3 = jax.block_until_ready(dotprod_layer(h3, b))
    ref3 = jnp.reshape(jnp.reshape(h3, (-1, dim)) @ b.T, (-1,))
    assert out3.shape == (7,), out3.shape
    assert jnp.allclose(out3, ref3, atol=1e-5, rtol=1e-5)

    # 3) Large dim (dim=256), ragged N (N=21): MXU general path, >=2 grid steps.
    dim2 = 256
    b2 = init_dotprod_params(k_p2, dim2)
    h2 = jax.random.normal(k_x2, (3, 7, dim2), dtype=jnp.float32)
    out2 = jax.block_until_ready(dotprod_layer(h2, b2))
    ref2 = jnp.reshape(jnp.reshape(h2, (-1, dim2)) @ b2.T, (-1,))
    assert out2.shape == (21,), out2.shape
    assert jnp.allclose(out2, ref2, atol=1e-5, rtol=1e-5)

    print("KERNEL_OK")
</pallas_src>

<mosaic_0001>
module attributes {stable_mosaic.version = 11 : i64} {
  func.func @_dotprod_packed_kernel(%arg0: i32, %arg1: memref<8x128xf32, #tpu.memory_space<vmem>>, %arg2: memref<128x4xf32, #tpu.memory_space<vmem>>, %arg3: memref<8x4xf32, #tpu.memory_space<vmem>>) attributes {dimension_semantics = [#tpu.dimension_semantics<parallel>], iteration_bounds = array<i64: 1>, scalar_prefetch = 0 : i64, scratch_operands = 0 : i64, tpu.core_type = #tpu.core_type<tc>, window_params = [{transform_indices = @transform_0, window_bounds = array<i64: 8, 128>}, {pipeline_mode = #tpu.pipeline_mode<synchronous>, transform_indices = @transform_1, window_bounds = array<i64: 128, 4>}, {transform_indices = @transform_2, window_bounds = array<i64: 8, 4>}]} {
    %c0 = arith.constant 0 : index
    %c0_0 = arith.constant 0 : index
    %0 = vector.load %arg1[%c0, %c0_0] : memref<8x128xf32, #tpu.memory_space<vmem>>, vector<8x128xf32>
    %c0_1 = arith.constant 0 : index
    %c0_2 = arith.constant 0 : index
    %1 = vector.load %arg2[%c0_1, %c0_2] : memref<128x4xf32, #tpu.memory_space<vmem>>, vector<128x4xf32>
    %cst = arith.constant dense<0.000000e+00> : vector<8x4xf32>
    %2 = tpu.matmul %0, %1, %cst {dimension_numbers = #tpu.dot_dimension_numbers<[1], [0], [0], [1], [0, 0, 1, 1], [], []>} : vector<8x128xf32>, vector<128x4xf32>, vector<8x4xf32> -> vector<8x4xf32>
    %c0_3 = arith.constant 0 : index
    %c0_4 = arith.constant 0 : index
    %3 = vector.load %arg3[%c0_3, %c0_4] : memref<8x4xf32, #tpu.memory_space<vmem>>, vector<8x4xf32>
    tpu.vector_store %arg3[%c0_3, %c0_4], %2 {strides = array<i32>} : memref<8x4xf32, #tpu.memory_space<vmem>>, vector<8x4xf32>,
    return
  }
  func.func @transform_0(%arg0: i32) -> (i32, i32) {
    %c0_i32 = arith.constant 0 : i32
    %c0_i32_0 = arith.constant 0 : i32
    return %arg0, %c0_i32 : i32, i32
  }
  func.func @transform_1(%arg0: i32) -> (i32, i32) {
    %c0_i32 = arith.constant 0 : i32
    %c0_i32_0 = arith.constant 0 : i32
    %c0_i32_1 = arith.constant 0 : i32
    return %c0_i32, %c0_i32_0 : i32, i32
  }
  func.func @transform_2(%arg0: i32) -> (i32, i32) {
    %c0_i32 = arith.constant 0 : i32
    %c0_i32_0 = arith.constant 0 : i32
    return %arg0, %c0_i32 : i32, i32
  }
}

</mosaic_0001>

<bundles_post_ra>
// kernel: tpu_custom_call.1
= control target key start
LH: loop header
LB: loop body
LE: loop exit
PB: predicated region body
PF: predicated region fallthrough
CT: control target
= control target key end

     0   :  { %7 = vsyncpa [#allocation3], 0  ;;  %v223_v2 = vmov 0.0|0.0   ;;  %vm224_vm0 = vmmov 0   ;;  %v225_v6 = vmov 0.0   ;;  %vm99_vm1 = vcmask 31744   ;;  %s307_s0 = inlined_call_operand.vmem [shape: f32[4,128], index: 0, kind: input, shape index: {}]   ;;  %s308_s1 = inlined_call_operand.vmem [shape: f32[128,4], index: 1, kind: input, shape index: {}]   ;;  %s309_s2 = inlined_call_operand.hbm [shape: f32[4,4], index: 2, kind: output, shape index: {}]  }
   0x1   :  { %v13_v0 = vld [vmem:[%s308_s1] sm:$0xff]  ;;  %v14_v1 = vld [vmem:[%s308_s1 + $0x8] sm:$0xff]  ;;  %169 = vmatprep.subr.bf16.mxu0 %v223_v2  ;;  %v15_v4 = vld [vmem:[%s308_s1 + $0x10] sm:$0xff]  ;;  %166 = vmatprep.mubr.msk.f32.mxu0 %vm224_vm0, %v225_v6 }
   0x2   :  { %v170_v3 = vpack.c.bf16 %v14_v1, %v13_v0  ;;  %v16_v5 = vld [vmem:[%s308_s1 + $0x18] sm:$0xff]  ;;  %v17_v8 = vld [vmem:[%s308_s1 + $0x20] sm:$0xff]  ;;  %v18_v9 = vld [vmem:[%s308_s1 + $0x28] sm:$0xff] }
   0x3   :  { %v173_v7 = vpack.c.bf16 %v16_v5, %v15_v4  ;;  %v176_v10 = vpack.c.bf16 %v18_v9, %v17_v8  ;;  %v19_v11 = vld [vmem:[%s308_s1 + $0x30] sm:$0xff]  ;;  %v20_v12 = vld [vmem:[%s308_s1 + $0x38] sm:$0xff]  ;;  %v21_v14 = vld [vmem:[%s308_s1 + $0x40] sm:$0xff] }
   0x4   :  { %171 = vmatpush3.bf16.msra.mxu0 %v170_v3  ;;  %v179_v13 = vpack.c.bf16 %v20_v12, %v19_v11  ;;  %v22_v15 = vld [vmem:[%s308_s1 + $0x48] sm:$0xff]  ;;  %v23_v17 = vld [vmem:[%s308_s1 + $0x50] sm:$0xff]  ;;  %v24_v18 = vld [vmem:[%s308_s1 + $0x58] sm:$0xff] }
   0x5   :  { %172 = vmatprep.subr.bf16.mxu0 %v223_v2  ;;  %v182_v16 = vpack.c.bf16 %v22_v15, %v21_v14  ;;  %v185_v19 = vpack.c.bf16 %v24_v18, %v23_v17  ;;  %v25_v20 = vld [vmem:[%s308_s1 + $0x60] sm:$0xff]  ;;  %v26_v21 = vld [vmem:[%s308_s1 + $0x68] sm:$0xff]  ;;  %v27_v23 = vld [vmem:[%s308_s1 + $0x70] sm:$0xff] }
   0x6   :  { %v188_v22 = vpack.c.bf16 %v26_v21, %v25_v20  ;;  %v28_v24 = vld [vmem:[%s308_s1 + $0x78] sm:$0xff]  ;;  %v12_v26 = vld [vmem:[%s307_s0] sm:$0xff] }
   0x7   :  { %v191_v25 = vpack.c.bf16 %v28_v24, %v27_v23 }
   0x8   :  { %174 = vmatpush3.bf16.msra.mxu0 %v173_v7 }
   0x9   :  { %175 = vmatprep.subr.bf16.mxu0 %v223_v2 }
   0xc   :  { %177 = vmatpush3.bf16.msra.mxu0 %v176_v10 }
   0xd   :  { %178 = vmatprep.subr.bf16.mxu0 %v223_v2 }
  0x10   :  { %180 = vmatpush3.bf16.msra.mxu0 %v179_v13 }
  0x11   :  { %181 = vmatprep.subr.bf16.mxu0 %v223_v2 }
  0x14   :  { %183 = vmatpush3.bf16.msra.mxu0 %v182_v16 }
  0x15   :  { %184 = vmatprep.subr.bf16.mxu0 %v223_v2 }
  0x18   :  { %186 = vmatpush3.bf16.msra.mxu0 %v185_v19 }
  0x19   :  { %187 = vmatprep.subr.bf16.mxu0 %v223_v2 }
  0x1c   :  { %189 = vmatpush3.bf16.msra.mxu0 %v188_v22 }
  0x1d   :  { %190 = vmatprep.subr.bf16.mxu0 %v223_v2 }
  0x20   :  { %192 = vmatpush3.bf16.msra.mxu0 %v191_v25 }
  0x23   :  { %167 = vmatmul.mubr.f32.vlgmr.msra.gmra.mrb[0].mxu0 %v12_v26 }
  0xf6   :  { %v95_v27 = vpop.f32.mrb[0].mxu0 }
  0xf7   :  { %100 = vst.msk [vmem:[#allocation2] sm:$0xff] %vm99_vm1, %v95_v27  ;;  %v168_v28 = vpop.f32.mrb[1].mxu0 }
  0xf8   :  { %105 = vsyncadd [#allocation3], 64  ;;  %s226_s15 = smov [#allocation2]  }
  0xf9   :  { %s106_s16 = sshll.u32 %s226_s15, 4  ;;  %s107_s16 = int_to_ptr.vmem [resolvable:$true] %s106_s16 }
  0xfa   :  { %s199_s17 = scalar_lea.vmem %s107_s16, 64  ;;  %s203_s1 = scalar_lea.vmem %s107_s16, 128 }
  0xfb   :  { %p200_p0 = scmp.ne.s32.totalorder %s107_s16, %s199_s17  ;;  %p204_p1 = scmp.lt.s32.totalorder %s107_s16, %s107_s16 }
  0xfc   :  { %p205_p2 = scmp.lt.s32.totalorder %s203_s1, %s199_s17 }
  0xfe   :  { %p206_p3 = por %p205_p2, %p204_p1 }
 0x100   :  { %p207_p4 = pnand %p206_p3, %p200_p0 }
 0x102   :  { %210 = shalt.err (!%p207_p4)
}
 0x103   :  { %s211_s0 = scalar_lea.hbm %s309_s2, 64 }
 0x104   :  { %p212_p5 = scmp.ne.s32.totalorder %s309_s2, %s211_s0  ;;  %p215_p6 = scmp.lt.u32.totalorder %s211_s0, %s309_s2 }
 0x106   :  { %p217_p7 = pnand %p215_p6, %p212_p5 }
 0x108   :  { %220 = shalt.err (!%p217_p7)
}
 0x109   :  { %s227_s24 = smov 64   ;;  %s228_s25 = smov 4  }
 0x10a   :  { %112 = dma.vmem_to_hbm [thread:$0]  %s107_s16, 64, %s309_s2, [#allocation3], %s227_s24, %s227_s24, %s228_s25  }
 0x10b   :  { %221 = dma.done.wait [#allocation3], 128  }
 0x10c   :  { %222 = vsyncadd [#allocation3], 4294967168 }
 0x10d   :  { %116 = vsyncpa [#allocation3], 1 }

</bundles_post_ra>
